<compile_context>
chip_gen: v7x
topology: tpu7x:2x2x1
jax: 0.10.0
libtpu: 0.0.40
codegen_flags: <defaults>
</compile_context>

<pallas_src>
import functools

import jax
import jax.numpy as jnp
from jax.experimental import pallas as pl
from jax.experimental.pallas import tpu as pltpu


def _cdiv(a: int, b: int) -> int:
    return -(-a // b)


def _round_up(x: int, m: int) -> int:
    return ((x + m - 1) // m) * m


def _layernorm_kernel(x_ref, a_ref, b_ref, o_ref, *, eps: float, n_feat: int,
                      n_seg: int):
    """Normalize each length-n_feat segment of every row of the block.

    Block layout is (tile_rows, n_seg * n_feat). When n_seg > 1 the wrapper has
    folded n_seg consecutive logical rows into the lane axis so loads/stores
    stay full lane width (unmasked vst, dense VMEM/DMA) even for small F.
    Statistics are computed strictly per segment (per logical row).
    """
    # For bf16 inputs on v6e/v7x one could keep the affine in bf16 (stats in
    # f32) to halve VMEM temporaries; kept in f32 here for v5e portability.
    x = x_ref[...].astype(jnp.float32)          # (T, W)
    a = a_ref[...]                              # (1, W) f32 (pre-cast/tiled)
    b = b_ref[...]
    inv_n = 1.0 / float(n_feat)
    inv_nm1 = 1.0 / float(n_feat - 1)           # unbiased std, like torch

    if n_seg == 1:
        # Two-pass stats: robust to large means; compute is far from the
        # bottleneck (kernel is HBM-bound), so this is essentially free.
        mean = jnp.sum(x, axis=-1, keepdims=True) * inv_n
        d = x - mean
        var = jnp.sum(d * d, axis=-1, keepdims=True) * inv_nm1
        inv_std = 1.0 / (jnp.sqrt(var) + eps)   # exact; eps added to std
        o_ref[...] = (a * (d * inv_std) + b).astype(o_ref.dtype)
        return

    # Packed path: per-segment reductions via f32 lane masks. Everything stays
    # full lane width (no slicing / reshape / concat), so the output store is a
    # dense unmasked vst; the extra masked reductions are VALU/XLU work hidden
    # under the HBM roofline for the small n_seg (<= 8) the wrapper allows.
    w = n_seg * n_feat
    lane = jax.lax.broadcasted_iota(jnp.int32, (1, w), 1)
    masks = [
        jnp.where((lane >= g * n_feat) & (lane < (g + 1) * n_feat), 1.0, 0.0)
        for g in range(n_seg)
    ]                                            # each (1, W) f32

    mean_full = jnp.zeros_like(x)
    for m in masks:
        s1 = jnp.sum(x * m, axis=-1, keepdims=True)          # segment sum
        mean_full = mean_full + (s1 * inv_n) * m
    d = x - mean_full
    d2 = d * d
    inv_full = jnp.zeros_like(x)
    for m in masks:
        var = jnp.sum(d2 * m, axis=-1, keepdims=True) * inv_nm1
        inv_full = inv_full + (1.0 / (jnp.sqrt(var) + eps)) * m
    o_ref[...] = (a * (d * inv_full) + b).astype(o_ref.dtype)


def _pick_tile_rows(rows: int, width: int, dtype, target_block_bytes: int) -> int:
    """Row tile: ~target_block_bytes per block, sublane-packed, >= ~8 grid steps."""
    itemsize = jnp.dtype(dtype).itemsize
    pack = 8 * max(1, 4 // max(1, itemsize))     # 8 f32 / 16 bf16 / 32 int8
    bytes_per_row = max(1, width * itemsize)
    t = max(pack, target_block_bytes // bytes_per_row)
    t = max(pack, (t // pack) * pack)
    # Floor of ~8 grid steps (>= 4 per TensorCore on v7x) when rows allow:
    # with too few steps the pipeline has no steady state and prologue/epilogue
    # DMA is fully exposed; per-step overhead is only ~0.35 us so extra steps
    # are cheap.
    min_steps = 8
    if rows >= 2 * pack:
        t = min(t, _round_up(_cdiv(rows, min_steps), pack))
    if t >= rows:
        return rows          # single full-extent block (always a legal shape)
    return max(t, pack)


def layer_norm(x, a_2, b_2, *, eps=1e-6, tile_rows=None, target_block_bytes=None):
    """LayerNorm over the last axis of x, matching the PyTorch module."""
    features = x.shape[-1]
    assert features > 1, "std over a single feature is NaN (matches torch.std)"
    assert a_2.shape == (features,) and b_2.shape == (features,)

    orig_shape = x.shape
    x2 = x.reshape(-1, features)                 # (R, F)
    rows = x2.shape[0]
    itemsize = jnp.dtype(x.dtype).itemsize

    # Lane packing: if F is a small divisor of 128, fold n_seg = 128 // F
    # consecutive rows into the lane axis so blocks are 128-lane dense
    # (unmasked stores, dense VMEM + DMA). The reshape is a free metadata
    # change on a contiguous (R, F) array. Gated to n_seg <= 8 (so the extra
    # masked reductions stay hidden) and rows % n_seg == 0 (no padding pass);
    # otherwise fall back to the plain, still-correct path.
    n_seg = 1
    if features < 128 and 128 % features == 0:
        g = 128 // features
        if g <= 8 and rows % g == 0:
            n_seg = g
    width = features * n_seg
    xk = x2 if n_seg == 1 else x2.reshape(rows // n_seg, width)
    rows_k = xk.shape[0]

    # Params: cast + tile once here, not per grid step inside the kernel.
    a2 = jnp.tile(a_2.reshape(1, features).astype(jnp.float32), (1, n_seg))
    b2 = jnp.tile(b_2.reshape(1, features).astype(jnp.float32), (1, n_seg))

    if target_block_bytes is None:
        # ~4 MiB blocks for 32-bit inputs, ~2 MiB for 16-bit (their in-kernel
        # f32 working copies double the footprint) — double-buffered in+out
        # plus temporaries stays well under the 48 MiB scoped cap below.
        target_block_bytes = (4 << 20) if itemsize >= 4 else (2 << 20)
    if tile_rows is None:
        tile_rows = _pick_tile_rows(rows_k, width, x.dtype, target_block_bytes)
    tile_rows = min(tile_rows, rows_k)

    grid = (_cdiv(rows_k, tile_rows),)

    # Advisory cost so XLA can overlap neighbouring HLOs with this mem-bound call.
    cost = pl.CostEstimate(
        flops=8 * rows * features,
        transcendentals=2 * rows,
        bytes_accessed=2 * rows * features * itemsize + 2 * features * 4,
    )

    kernel = functools.partial(_layernorm_kernel, eps=float(eps),
                               n_feat=features, n_seg=n_seg)

    out = pl.pallas_call(
        kernel,
        out_shape=jax.ShapeDtypeStruct((rows_k, width), x.dtype),
        grid_spec=pltpu.PrefetchScalarGridSpec(
            num_scalar_prefetch=0,
            grid=grid,
            in_specs=[
                # pipeline_mode=pl.Buffered(3) is a possible follow-up, but only
                # if a profile shows exposed input DMA (review guidance).
                pl.BlockSpec((tile_rows, width), lambda i: (i, 0)),
                pl.BlockSpec((1, width), lambda i: (0, 0)),   # constant block
                pl.BlockSpec((1, width), lambda i: (0, 0)),
            ],
            out_specs=pl.BlockSpec((tile_rows, width), lambda i: (i, 0)),
        ),
        compiler_params=pltpu.CompilerParams(
            dimension_semantics=("parallel",),   # row blocks independent (megacore)
            # 48 MiB: safe on v5e/v6e (128 MiB physical), headroom on v7x
            # (64 MiB per TC), and load-bearing on v5e's 16 MiB default scoped cap.
            vmem_limit_bytes=48 << 20,
        ),
        cost_estimate=cost,
    )(xk, a2, b2)

    return out.reshape(orig_shape)


if __name__ == "__main__":
    key = jax.random.PRNGKey(0)
    batch, seq, hidden = 2, 8, 32

    x = jax.random.normal(key, (batch, seq, hidden), dtype=jnp.float32)
    # Deterministic parameter init mirroring nn.Parameter(torch.ones/zeros)
    a_2 = jnp.ones((hidden,), dtype=jnp.float32)
    b_2 = jnp.zeros((hidden,), dtype=jnp.float32)
    eps = 1e-6

    y = jax.block_until_ready(layer_norm(x, a_2, b_2, eps=eps))

    # Reference (pure JAX): unbiased std (N-1), eps added to std — the exact
    # semantics of the PyTorch module.
    mean = jnp.mean(x, axis=-1, keepdims=True)
    var = jnp.sum((x - mean) ** 2, axis=-1, keepdims=True) / (hidden - 1)
    ref = a_2 * (x - mean) / (jnp.sqrt(var) + eps) + b_2

    assert y.shape == x.shape and y.dtype == x.dtype
    err = float(jnp.max(jnp.abs(y - ref)))
    assert err < 1e-4, f"mismatch vs reference: {err}"
    print("KERNEL_OK")
</pallas_src>

<mosaic_0001>
module attributes {stable_mosaic.version = 11 : i64} {
  func.func @_layernorm_kernel(%arg0: i32, %arg1: memref<4x128xf32, #tpu.memory_space<vmem>>, %arg2: memref<1x128xf32, #tpu.memory_space<vmem>>, %arg3: memref<1x128xf32, #tpu.memory_space<vmem>>, %arg4: memref<4x128xf32, #tpu.memory_space<vmem>>) attributes {dimension_semantics = [#tpu.dimension_semantics<parallel>], iteration_bounds = array<i64: 1>, scalar_prefetch = 0 : i64, scratch_operands = 0 : i64, tpu.core_type = #tpu.core_type<tc>, window_params = [{transform_indices = @transform_0, window_bounds = array<i64: 4, 128>}, {pipeline_mode = #tpu.pipeline_mode<synchronous>, transform_indices = @transform_1, window_bounds = array<i64: 1, 128>}, {pipeline_mode = #tpu.pipeline_mode<synchronous>, transform_indices = @transform_2, window_bounds = array<i64: 1, 128>}, {transform_indices = @transform_3, window_bounds = array<i64: 4, 128>}]} {
    %c0 = arith.constant 0 : index
    %c0_0 = arith.constant 0 : index
    %0 = vector.load %arg1[%c0, %c0_0] : memref<4x128xf32, #tpu.memory_space<vmem>>, vector<4x128xf32>
    %c0_1 = arith.constant 0 : index
    %c0_2 = arith.constant 0 : index
    %1 = vector.load %arg2[%c0_1, %c0_2] : memref<1x128xf32, #tpu.memory_space<vmem>>, vector<1x128xf32>
    %c0_3 = arith.constant 0 : index
    %c0_4 = arith.constant 0 : index
    %2 = vector.load %arg3[%c0_3, %c0_4] : memref<1x128xf32, #tpu.memory_space<vmem>>, vector<1x128xf32>
    %3 = tpu.iota {dimensions = array<i32: 1>} : vector<1x128xi32>
    %c0_i32 = arith.constant 0 : i32
    %4 = vector.broadcast %c0_i32 : i32 to vector<1x128xi32>
    %5 = arith.cmpi sge, %3, %4 : vector<1x128xi32>
    %c32_i32 = arith.constant 32 : i32
    %6 = vector.broadcast %c32_i32 : i32 to vector<1x128xi32>
    %7 = arith.cmpi slt, %3, %6 : vector<1x128xi32>
    %8 = arith.andi %5, %7 : vector<1x128xi1>
    %cst = arith.constant 1.000000e+00 : f32
    %cst_5 = arith.constant 0.000000e+00 : f32
    %9 = vector.broadcast %cst : f32 to vector<1x128xf32>
    %10 = vector.broadcast %cst_5 : f32 to vector<1x128xf32>
    %11 = arith.select %8, %9, %10 : vector<1x128xi1>, vector<1x128xf32>
    %c32_i32_6 = arith.constant 32 : i32
    %12 = vector.broadcast %c32_i32_6 : i32 to vector<1x128xi32>
    %13 = arith.cmpi sge, %3, %12 : vector<1x128xi32>
    %c64_i32 = arith.constant 64 : i32
    %14 = vector.broadcast %c64_i32 : i32 to vector<1x128xi32>
    %15 = arith.cmpi slt, %3, %14 : vector<1x128xi32>
    %16 = arith.andi %13, %15 : vector<1x128xi1>
    %cst_7 = arith.constant 1.000000e+00 : f32
    %cst_8 = arith.constant 0.000000e+00 : f32
    %17 = vector.broadcast %cst_7 : f32 to vector<1x128xf32>
    %18 = vector.broadcast %cst_8 : f32 to vector<1x128xf32>
    %19 = arith.select %16, %17, %18 : vector<1x128xi1>, vector<1x128xf32>
    %c64_i32_9 = arith.constant 64 : i32
    %20 = vector.broadcast %c64_i32_9 : i32 to vector<1x128xi32>
    %21 = arith.cmpi sge, %3, %20 : vector<1x128xi32>
    %c96_i32 = arith.constant 96 : i32
    %22 = vector.broadcast %c96_i32 : i32 to vector<1x128xi32>
    %23 = arith.cmpi slt, %3, %22 : vector<1x128xi32>
    %24 = arith.andi %21, %23 : vector<1x128xi1>
    %cst_10 = arith.constant 1.000000e+00 : f32
    %cst_11 = arith.constant 0.000000e+00 : f32
    %25 = vector.broadcast %cst_10 : f32 to vector<1x128xf32>
    %26 = vector.broadcast %cst_11 : f32 to vector<1x128xf32>
    %27 = arith.select %24, %25, %26 : vector<1x128xi1>, vector<1x128xf32>
    %c96_i32_12 = arith.constant 96 : i32
    %28 = vector.broadcast %c96_i32_12 : i32 to vector<1x128xi32>
    %29 = arith.cmpi sge, %3, %28 : vector<1x128xi32>
    %c128_i32 = arith.constant 128 : i32
    %30 = vector.broadcast %c128_i32 : i32 to vector<1x128xi32>
    %31 = arith.cmpi slt, %3, %30 : vector<1x128xi32>
    %32 = arith.andi %29, %31 : vector<1x128xi1>
    %cst_13 = arith.constant 1.000000e+00 : f32
    %cst_14 = arith.constant 0.000000e+00 : f32
    %33 = vector.broadcast %cst_13 : f32 to vector<1x128xf32>
    %34 = vector.broadcast %cst_14 : f32 to vector<1x128xf32>
    %35 = arith.select %32, %33, %34 : vector<1x128xi1>, vector<1x128xf32>
    %cst_15 = arith.constant 0.000000e+00 : f32
    %36 = vector.broadcast %cst_15 : f32 to vector<4x128xf32>
    %37 = vector.broadcast %11 : vector<1x128xf32> to vector<4x128xf32>
    %38 = arith.mulf %0, %37 : vector<4x128xf32>
    %cst_16 = arith.constant dense<0.000000e+00> : vector<4xf32>
    %39 = vector.multi_reduction <add>, %38, %cst_16 [1] : vector<4x128xf32> to vector<4xf32>
    %40 = vector.shape_cast %39 : vector<4xf32> to vector<4x1xf32>
    %cst_17 = arith.constant 3.125000e-02 : f32
    %41 = vector.broadcast %cst_17 : f32 to vector<4x1xf32>
    %42 = arith.mulf %40, %41 : vector<4x1xf32>
    %43 = vector.broadcast %42 : vector<4x1xf32> to vector<4x128xf32>
    %44 = vector.broadcast %11 : vector<1x128xf32> to vector<4x128xf32>
    %45 = arith.mulf %43, %44 : vector<4x128xf32>
    %46 = arith.addf %36, %45 : vector<4x128xf32>
    %47 = vector.broadcast %19 : vector<1x128xf32> to vector<4x128xf32>
    %48 = arith.mulf %0, %47 : vector<4x128xf32>
    %cst_18 = arith.constant dense<0.000000e+00> : vector<4xf32>
    %49 = vector.multi_reduction <add>, %48, %cst_18 [1] : vector<4x128xf32> to vector<4xf32>
    %50 = vector.shape_cast %49 : vector<4xf32> to vector<4x1xf32>
    %cst_19 = arith.constant 3.125000e-02 : f32
    %51 = vector.broadcast %cst_19 : f32 to vector<4x1xf32>
    %52 = arith.mulf %50, %51 : vector<4x1xf32>
    %53 = vector.broadcast %52 : vector<4x1xf32> to vector<4x128xf32>
    %54 = vector.broadcast %19 : vector<1x128xf32> to vector<4x128xf32>
    %55 = arith.mulf %53, %54 : vector<4x128xf32>
    %56 = arith.addf %46, %55 : vector<4x128xf32>
    %57 = vector.broadcast %27 : vector<1x128xf32> to vector<4x128xf32>
    %58 = arith.mulf %0, %57 : vector<4x128xf32>
    %cst_20 = arith.constant dense<0.000000e+00> : vector<4xf32>
    %59 = vector.multi_reduction <add>, %58, %cst_20 [1] : vector<4x128xf32> to vector<4xf32>
    %60 = vector.shape_cast %59 : vector<4xf32> to vector<4x1xf32>
    %cst_21 = arith.constant 3.125000e-02 : f32
    %61 = vector.broadcast %cst_21 : f32 to vector<4x1xf32>
    %62 = arith.mulf %60, %61 : vector<4x1xf32>
    %63 = vector.broadcast %62 : vector<4x1xf32> to vector<4x128xf32>
    %64 = vector.broadcast %27 : vector<1x128xf32> to vector<4x128xf32>
    %65 = arith.mulf %63, %64 : vector<4x128xf32>
    %66 = arith.addf %56, %65 : vector<4x128xf32>
    %67 = vector.broadcast %35 : vector<1x128xf32> to vector<4x128xf32>
    %68 = arith.mulf %0, %67 : vector<4x128xf32>
    %cst_22 = arith.constant dense<0.000000e+00> : vector<4xf32>
    %69 = vector.multi_reduction <add>, %68, %cst_22 [1] : vector<4x128xf32> to vector<4xf32>
    %70 = vector.shape_cast %69 : vector<4xf32> to vector<4x1xf32>
    %cst_23 = arith.constant 3.125000e-02 : f32
    %71 = vector.broadcast %cst_23 : f32 to vector<4x1xf32>
    %72 = arith.mulf %70, %71 : vector<4x1xf32>
    %73 = vector.broadcast %72 : vector<4x1xf32> to vector<4x128xf32>
    %74 = vector.broadcast %35 : vector<1x128xf32> to vector<4x128xf32>
    %75 = arith.mulf %73, %74 : vector<4x128xf32>
    %76 = arith.addf %66, %75 : vector<4x128xf32>
    %77 = arith.subf %0, %76 : vector<4x128xf32>
    %78 = arith.mulf %77, %77 : vector<4x128xf32>
    %cst_24 = arith.constant 0.000000e+00 : f32
    %79 = vector.broadcast %cst_24 : f32 to vector<4x128xf32>
    %80 = vector.broadcast %11 : vector<1x128xf32> to vector<4x128xf32>
    %81 = arith.mulf %78, %80 : vector<4x128xf32>
    %cst_25 = arith.constant dense<0.000000e+00> : vector<4xf32>
    %82 = vector.multi_reduction <add>, %81, %cst_25 [1] : vector<4x128xf32> to vector<4xf32>
    %83 = vector.shape_cast %82 : vector<4xf32> to vector<4x1xf32>
    %cst_26 = arith.constant 0.0322580636 : f32
    %84 = vector.broadcast %cst_26 : f32 to vector<4x1xf32>
    %85 = arith.mulf %83, %84 : vector<4x1xf32>
    %86 = math.sqrt %85 : vector<4x1xf32>
    %cst_27 = arith.constant 9.99999997E-7 : f32
    %87 = vector.broadcast %cst_27 : f32 to vector<4x1xf32>
    %88 = arith.addf %86, %87 : vector<4x1xf32>
    %cst_28 = arith.constant 1.000000e+00 : f32
    %89 = vector.broadcast %cst_28 : f32 to vector<4x1xf32>
    %90 = arith.divf %89, %88 : vector<4x1xf32>
    %91 = vector.broadcast %90 : vector<4x1xf32> to vector<4x128xf32>
    %92 = vector.broadcast %11 : vector<1x128xf32> to vector<4x128xf32>
    %93 = arith.mulf %91, %92 : vector<4x128xf32>
    %94 = arith.addf %79, %93 : vector<4x128xf32>
    %95 = vector.broadcast %19 : vector<1x128xf32> to vector<4x128xf32>
    %96 = arith.mulf %78, %95 : vector<4x128xf32>
    %cst_29 = arith.constant dense<0.000000e+00> : vector<4xf32>
    %97 = vector.multi_reduction <add>, %96, %cst_29 [1] : vector<4x128xf32> to vector<4xf32>
    %98 = vector.shape_cast %97 : vector<4xf32> to vector<4x1xf32>
    %cst_30 = arith.constant 0.0322580636 : f32
    %99 = vector.broadcast %cst_30 : f32 to vector<4x1xf32>
    %100 = arith.mulf %98, %99 : vector<4x1xf32>
    %101 = math.sqrt %100 : vector<4x1xf32>
    %cst_31 = arith.constant 9.99999997E-7 : f32
    %102 = vector.broadcast %cst_31 : f32 to vector<4x1xf32>
    %103 = arith.addf %101, %102 : vector<4x1xf32>
    %cst_32 = arith.constant 1.000000e+00 : f32
    %104 = vector.broadcast %cst_32 : f32 to vector<4x1xf32>
    %105 = arith.divf %104, %103 : vector<4x1xf32>
    %106 = vector.broadcast %105 : vector<4x1xf32> to vector<4x128xf32>
    %107 = vector.broadcast %19 : vector<1x128xf32> to vector<4x128xf32>
    %108 = arith.mulf %106, %107 : vector<4x128xf32>
    %109 = arith.addf %94, %108 : vector<4x128xf32>
    %110 = vector.broadcast %27 : vector<1x128xf32> to vector<4x128xf32>
    %111 = arith.mulf %78, %110 : vector<4x128xf32>
    %cst_33 = arith.constant dense<0.000000e+00> : vector<4xf32>
    %112 = vector.multi_reduction <add>, %111, %cst_33 [1] : vector<4x128xf32> to vector<4xf32>
    %113 = vector.shape_cast %112 : vector<4xf32> to vector<4x1xf32>
    %cst_34 = arith.constant 0.0322580636 : f32
    %114 = vector.broadcast %cst_34 : f32 to vector<4x1xf32>
    %115 = arith.mulf %113, %114 : vector<4x1xf32>
    %116 = math.sqrt %115 : vector<4x1xf32>
    %cst_35 = arith.constant 9.99999997E-7 : f32
    %117 = vector.broadcast %cst_35 : f32 to vector<4x1xf32>
    %118 = arith.addf %116, %117 : vector<4x1xf32>
    %cst_36 = arith.constant 1.000000e+00 : f32
    %119 = vector.broadcast %cst_36 : f32 to vector<4x1xf32>
    %120 = arith.divf %119, %118 : vector<4x1xf32>
    %121 = vector.broadcast %120 : vector<4x1xf32> to vector<4x128xf32>
    %122 = vector.broadcast %27 : vector<1x128xf32> to vector<4x128xf32>
    %123 = arith.mulf %121, %122 : vector<4x128xf32>
    %124 = arith.addf %109, %123 : vector<4x128xf32>
    %125 = vector.broadcast %35 : vector<1x128xf32> to vector<4x128xf32>
    %126 = arith.mulf %78, %125 : vector<4x128xf32>
    %cst_37 = arith.constant dense<0.000000e+00> : vector<4xf32>
    %127 = vector.multi_reduction <add>, %126, %cst_37 [1] : vector<4x128xf32> to vector<4xf32>
    %128 = vector.shape_cast %127 : vector<4xf32> to vector<4x1xf32>
    %cst_38 = arith.constant 0.0322580636 : f32
    %129 = vector.broadcast %cst_38 : f32 to vector<4x1xf32>
    %130 = arith.mulf %128, %129 : vector<4x1xf32>
    %131 = math.sqrt %130 : vector<4x1xf32>
    %cst_39 = arith.constant 9.99999997E-7 : f32
    %132 = vector.broadcast %cst_39 : f32 to vector<4x1xf32>
    %133 = arith.addf %131, %132 : vector<4x1xf32>
    %cst_40 = arith.constant 1.000000e+00 : f32
    %134 = vector.broadcast %cst_40 : f32 to vector<4x1xf32>
    %135 = arith.divf %134, %133 : vector<4x1xf32>
    %136 = vector.broadcast %135 : vector<4x1xf32> to vector<4x128xf32>
    %137 = vector.broadcast %35 : vector<1x128xf32> to vector<4x128xf32>
    %138 = arith.mulf %136, %137 : vector<4x128xf32>
    %139 = arith.addf %124, %138 : vector<4x128xf32>
    %140 = arith.mulf %77, %139 : vector<4x128xf32>
    %141 = vector.broadcast %1 : vector<1x128xf32> to vector<4x128xf32>
    %142 = arith.mulf %141, %140 : vector<4x128xf32>
    %143 = vector.broadcast %2 : vector<1x128xf32> to vector<4x128xf32>
    %144 = arith.addf %142, %143 : vector<4x128xf32>
    %c0_41 = arith.constant 0 : index
    %c0_42 = arith.constant 0 : index
    %145 = vector.load %arg4[%c0_41, %c0_42] : memref<4x128xf32, #tpu.memory_space<vmem>>, vector<4x128xf32>
    tpu.vector_store %arg4[%c0_41, %c0_42], %144 {strides = array<i32>} : memref<4x128xf32, #tpu.memory_space<vmem>>, vector<4x128xf32>,
    return
  }
  func.func @transform_0(%arg0: i32) -> (i32, i32) {
    %c0_i32 = arith.constant 0 : i32
    %c0_i32_0 = arith.constant 0 : i32
    return %arg0, %c0_i32 : i32, i32
  }
  func.func @transform_1(%arg0: i32) -> (i32, i32) {
    %c0_i32 = arith.constant 0 : i32
    %c0_i32_0 = arith.constant 0 : i32
    %c0_i32_1 = arith.constant 0 : i32
    return %c0_i32, %c0_i32_0 : i32, i32
  }
  func.func @transform_2(%arg0: i32) -> (i32, i32) {
    %c0_i32 = arith.constant 0 : i32
    %c0_i32_0 = arith.constant 0 : i32
    %c0_i32_1 = arith.constant 0 : i32
    return %c0_i32, %c0_i32_0 : i32, i32
  }
  func.func @transform_3(%arg0: i32) -> (i32, i32) {
    %c0_i32 = arith.constant 0 : i32
    %c0_i32_0 = arith.constant 0 : i32
    return %arg0, %c0_i32 : i32, i32
  }
}

</mosaic_0001>

<bundles_post_ra>
// kernel: tpu_custom_call.1
= control target key start
LH: loop header
LB: loop body
LE: loop exit
PB: predicated region body
PF: predicated region fallthrough
CT: control target
= control target key end

     0   :  { %8 = vsyncpa [#allocation3], 0  ;;  %s337_s0 = inlined_call_operand.hbm [shape: f32[4,128], index: 0, kind: input, shape index: {}]   ;;  %s338_s1 = inlined_call_operand.vmem [shape: f32[1,128], index: 1, kind: input, shape index: {}]   ;;  %s339_s2 = inlined_call_operand.vmem [shape: f32[1,128], index: 2, kind: input, shape index: {}]   ;;  %s340_s3 = inlined_call_operand.hbm [shape: f32[4,128], index: 3, kind: output, shape index: {}]  }
   0x1   :  { %9 = vsyncpa [#allocation4], 0  ;;  %s247_s12 = smov [#allocation2]   ;;  %s199_s16 = scalar_lea.hbm %s337_s0, 64 }
   0x2   :  { %s16_s13 = sshll.u32 %s247_s12, 4  ;;  %p200_p0 = scmp.ne.s32.totalorder %s337_s0, %s199_s16  ;;  %s17_s13 = int_to_ptr.vmem [resolvable:$true] %s16_s13 }
   0x3   :  { %p203_p1 = scmp.lt.u32.totalorder %s199_s16, %s337_s0 }
   0x5   :  { %p205_p2 = pnand %p203_p1, %p200_p0 }
   0x7   :  { %208 = shalt.err (!%p205_p2)
}
   0x8   :  { %s209_s21 = scalar_lea.vmem %s17_s13, 64  ;;  %p214_p4 = scmp.lt.s32.totalorder %s17_s13, %s17_s13 }
   0x9   :  { %p210_p3 = scmp.ne.s32.totalorder %s17_s13, %s209_s21  ;;  %p215_p5 = scmp.lt.s32.totalorder %s209_s21, %s209_s21 }
   0xb   :  { %p216_p6 = por %p215_p5, %p214_p4 }
   0xd   :  { %p217_p7 = pnand %p216_p6, %p210_p3 }
   0xf   :  { %220 = shalt.err (!%p217_p7)
}
  0x10   :  { %19 = dma.hbm_to_vmem [thread:$0]  %s337_s0, 64, %s17_s13, [#allocation3]  }
  0x11   :  { %243 = dma.done.wait [#allocation3], 64  }
  0x12   :  { %244 = vsyncadd [#allocation3], 4294967232  ;;  %v30_v0 = vlaneseq  ;;  %v248_v2 = vmov 0.0   ;;  %v27_v6 = vld [vmem:[#allocation2] sm:$0xf]  ;;  %vm49_vm8 = vcmask 1043456  }
  0x13   :  { %s249_s27 = smov [#allocation5]  }
  0x14   :  { %v31_v1 = vand.u32 127, %v30_v0  ;;  %s169_s28 = sshll.u32 %s249_s27, 4  ;;  %s170_s28 = int_to_ptr.vmem [resolvable:$true] %s169_s28 }
  0x15   :  { %s221_s29 = scalar_lea.vmem %s170_s28, 64  ;;  %p226_p9 = scmp.lt.s32.totalorder %s170_s28, %s170_s28 }
  0x16   :  { %vm33_vm0 = vcmp.lt.s32.totalorder %v31_v1, 32  ;;  %vm40_vm1 = vcmp.ge.s32.totalorder %v31_v1, 64  ;;  %vm41_vm2 = vcmp.lt.s32.totalorder %v31_v1, 96  ;;  %vm36_vm3 = vcmp.ge.s32.totalorder %v31_v1, 32  ;;  %p222_p8 = scmp.ne.s32.totalorder %s170_s28, %s221_s29  ;;  %p227_p10 = scmp.lt.s32.totalorder %s221_s29, %s221_s29 }
  0x17   :  { %v282_v3 = vsel %vm33_vm0, 1.0, %v248_v2  ;;  %vm42_vm4 = vmand %vm40_vm1, %vm41_vm2  ;;  %vm37_vm5 = vcmp.lt.s32.totalorder %v31_v1, 64  ;;  %vm44_vm6 = vcmp.ge.s32.totalorder %v31_v1, 96 }
  0x18   :  { %v284_v4 = vsel %vm42_vm4, 1.0, %v248_v2  ;;  %vm38_vm7 = vmand %vm36_vm3, %vm37_vm5  ;;  %v286_v5 = vsel %vm44_vm6, 1.0, %v248_v2  ;;  %v48_v8 = vmul.f32 %v282_v3, %v27_v6  ;;  %p228_p11 = por %p227_p10, %p226_p9 }
  0x19   :  { %v288_v7 = vsel %vm38_vm7, 1.0, %v248_v2  ;;  %v63_v9 = vmul.f32 %v284_v4, %v27_v6  ;;  %v70_v11 = vmul.f32 %v286_v5, %v27_v6 }
  0x1a   :  { %v56_v10 = vmul.f32 %v288_v7, %v27_v6  ;;  %v50_v12 = vsel %vm49_vm8, %v48_v8, 0.0  ;;  %p229_p12 = pnand %p228_p11, %p222_p8 }
  0x1b   :  { %v64_v13 = vsel %vm49_vm8, %v63_v9, 0.0  ;;  %51 = vadd.xlane.f32.xlu0 %v50_v12  ;;  %v71_v15 = vsel %vm49_vm8, %v70_v11, 0.0 }
  0x1c   :  { %65 = vadd.xlane.f32.xlu1 %v64_v13  ;;  %v57_v14 = vsel %vm49_vm8, %v56_v10, 0.0 }
  0x1f   :  { %58 = vadd.xlane.f32.xlu0 %v57_v14 }
  0x20   :  { %72 = vadd.xlane.f32.xlu1 %v71_v15 }
  0xa8   :  { %v52_v16 = vpop.xlane.xlu0 %51 }
  0xa9   :  { %v66_v17 = vpop.xlane.xlu1 %65  ;;  %v53_v18 = vmul.f32 0.03125, %v52_v16 }
  0xaa   :  { %v67_v21 = vmul.f32 0.03125, %v66_v17 }
  0xab   :  { %v54_v24 = vmul.f32 %v53_v18, %v282_v3 }
  0xac   :  { %v59_v19 = vpop.xlane.xlu0 %58  ;;  %v68_v26 = vmul.f32 %v67_v21, %v284_v4 }
  0xad   :  { %v73_v20 = vpop.xlane.xlu1 %72  ;;  %v60_v22 = vmul.f32 0.03125, %v59_v19 }
  0xae   :  { %v74_v23 = vmul.f32 0.03125, %v73_v20 }
  0xaf   :  { %v61_v25 = vmul.f32 %v60_v22, %v288_v7 }
  0xb0   :  { %v75_v28 = vmul.f32 %v74_v23, %v286_v5 }
  0xb1   :  { %v62_v27 = vadd.f32 %v61_v25, %v54_v24  ;;  %v178_v24 = vld [vmem:[%s338_s1] ss:$0 sm:$0xff] }
  0xb3   :  { %v69_v29 = vadd.f32 %v68_v26, %v62_v27 }
  0xb5   :  { %v76_v30 = vadd.f32 %v75_v28, %v69_v29 }
  0xb7   :  { %v302_v31 = vsub.f32 %v27_v6, %v76_v30 }
  0xb9   :  { %v78_v32 = vmul.f32 %v302_v31, %v302_v31 }
  0xbb   :  { %v96_v33 = vmul.f32 %v78_v32, %v288_v7  ;;  %v79_v34 = vmul.f32 %v78_v32, %v282_v3  ;;  %v130_v37 = vmul.f32 %v78_v32, %v286_v5  ;;  %v113_v38 = vmul.f32 %v78_v32, %v284_v4 }
  0xbd   :  { %v97_v35 = vsel %vm49_vm8, %v96_v33, 0.0  ;;  %v80_v36 = vsel %vm49_vm8, %v79_v34, 0.0  ;;  %v131_v39 = vsel %vm49_vm8, %v130_v37, 0.0  ;;  %v114_v40 = vsel %vm49_vm8, %v113_v38, 0.0 }
  0xbe   :  { %98 = vadd.xlane.f32.xlu1 %v97_v35  ;;  %81 = vadd.xlane.f32.xlu0 %v80_v36 }
  0xc2   :  { %132 = vadd.xlane.f32.xlu1 %v131_v39  ;;  %115 = vadd.xlane.f32.xlu0 %v114_v40 }
 0x14b   :  { %v99_v41 = vpop.xlane.xlu1 %98  ;;  %v82_v42 = vpop.xlane.xlu0 %81 }
 0x14c   :  { %v100_v43 = vmul.f32 0.032258064, %v99_v41  ;;  %v83_v44 = vmul.f32 0.032258064, %v82_v42 }
 0x14e   :  { %183 = vrsqrt.f32 %v100_v43  ;;  %vm103_vm9 = vcmp.eq.f32.partialorder %v100_v43, inf  ;;  %v106_v52 = vand.u32 2147483648, %v100_v43  ;;  %vm105_vm10 = vcmp.eq.f32.partialorder %v100_v43, 0.0 }
 0x14f   :  { %185 = vrsqrt.f32 %v83_v44  ;;  %v133_v45 = vpop.xlane.xlu1 %132  ;;  %v116_v46 = vpop.xlane.xlu0 %115  ;;  %vm86_vm11 = vcmp.eq.f32.partialorder %v83_v44, inf  ;;  %v89_v55 = vand.u32 2147483648, %v83_v44  ;;  %vm88_vm12 = vcmp.eq.f32.partialorder %v83_v44, 0.0 }
 0x150   :  { %v134_v47 = vmul.f32 0.032258064, %v133_v45  ;;  %v117_v48 = vmul.f32 0.032258064, %v116_v46 }
 0x152   :  { %187 = vrsqrt.f32 %v134_v47  ;;  %vm137_vm13 = vcmp.eq.f32.partialorder %v134_v47, inf  ;;  %vm139_vm14 = vcmp.eq.f32.partialorder %v134_v47, 0.0  ;;  %v140_v0 = vand.u32 2147483648, %v134_v47 }
 0x153   :  { %189 = vrsqrt.f32 %v117_v48  ;;  %vm120_vm15 = vcmp.eq.f32.partialorder %v117_v48, inf  ;;  %v123_v6 = vand.u32 2147483648, %v117_v48  ;;  %vm122_vm0 = vcmp.eq.f32.partialorder %v117_v48, 0.0 }
 0x158   :  { %v184_v49 = vpop.eup %183 }
 0x159   :  { %v186_v50 = vpop.eup %185  ;;  %v102_v51 = vmul.f32 %v184_v49, %v100_v43 }
 0x15a   :  { %v85_v53 = vmul.f32 %v186_v50, %v83_v44 }
 0x15b   :  { %v104_v54 = vsel %vm103_vm9, %v100_v43, %v102_v51 }
 0x15c   :  { %v188_v56 = vpop.eup %187  ;;  %v107_v57 = vsel %vm105_vm10, %v106_v52, %v104_v54  ;;  %v87_v58 = vsel %vm86_vm11, %v83_v44, %v85_v53 }
 0x15d   :  { %v190_v59 = vpop.eup %189  ;;  %v108_v60 = vadd.f32 1e-06, %v107_v57  ;;  %v90_v61 = vsel %vm88_vm12, %v89_v55, %v87_v58  ;;  %v136_v62 = vmul.f32 %v188_v56, %v134_v47 }
 0x15e   :  { %v91_v63 = vadd.f32 1e-06, %v90_v61  ;;  %v119_v1 = vmul.f32 %v190_v59, %v117_v48 }
 0x15f   :  { %191 = vrcp.f32 %v108_v60  ;;  %v138_v2 = vsel %vm137_vm13, %v134_v47, %v136_v62 }
 0x160   :  { %193 = vrcp.f32 %v91_v63  ;;  %v141_v8 = vsel %vm139_vm14, %v140_v0, %v138_v2  ;;  %v121_v9 = vsel %vm120_vm15, %v117_v48, %v119_v1 }
 0x161   :  { %v142_v10 = vadd.f32 1e-06, %v141_v8  ;;  %v124_v11 = vsel %vm122_vm0, %v123_v6, %v121_v9 }
 0x162   :  { %v125_v12 = vadd.f32 1e-06, %v124_v11 }
 0x163   :  { %195 = vrcp.f32 %v142_v10 }
 0x164   :  { %197 = vrcp.f32 %v125_v12 }
 0x169   :  { %v192_v13 = vpop.eup %191 }
 0x16a   :  { %v194_v14 = vpop.eup %193  ;;  %v111_v16 = vmul.f32 %v192_v13, %v288_v7 }
 0x16b   :  { %v94_v15 = vmul.f32 %v194_v14, %v282_v3  ;;  %v179_v3 = vld [vmem:[%s339_s2] ss:$0 sm:$0xff] }
 0x16d   :  { %v196_v17 = vpop.eup %195  ;;  %v112_v19 = vadd.f32 %v111_v16, %v94_v15 }
 0x16e   :  { %v198_v18 = vpop.eup %197  ;;  %v145_v22 = vmul.f32 %v196_v17, %v286_v5 }
 0x16f   :  { %v128_v20 = vmul.f32 %v198_v18, %v284_v4 }
 0x171   :  { %v129_v21 = vadd.f32 %v128_v20, %v112_v19 }
 0x173   :  { %v146_v23 = vadd.f32 %v145_v22, %v129_v21 }
 0x175   :  { %v147_v25 = vmul.f32 %v146_v23, %v302_v31 }
 0x177   :  { %v154_v7 = vmul.f32 %v178_v24, %v147_v25 }
 0x179   :  { %v161_v26 = vadd.f32 %v179_v3, %v154_v7 }
 0x17b   :  { %162 = vst [vmem:[#allocation5] sm:$0xf] %v161_v26 }
 0x17c   :  { %232 = shalt.err (!%p229_p12)
}
 0x17d   :  { %s233_s4 = scalar_lea.hbm %s340_s3, 64 }
 0x17e   :  { %p234_p13 = scmp.ne.s32.totalorder %s340_s3, %s233_s4  ;;  %p237_p0 = scmp.lt.u32.totalorder %s233_s4, %s340_s3 }
 0x180   :  { %p239_p1 = pnand %p237_p0, %p234_p13 }
 0x182   :  { %242 = shalt.err (!%p239_p1)
}
 0x183   :  { %172 = dma.vmem_to_hbm [thread:$0]  %s170_s28, 64, %s340_s3, [#allocation4]  }
 0x184   :  { %245 = dma.done.wait [#allocation4], 64  }
 0x185   :  { %246 = vsyncadd [#allocation4], 4294967232 }
 0x186   :  { %176 = vsyncpa [#allocation3], 1 }
 0x187   :  { %177 = vsyncpa [#allocation4], 1 }

</bundles_post_ra>
